<compile_context>
chip_gen: v7x
topology: tpu7x:2x2x1
jax: 0.10.0
libtpu: 0.0.40
codegen_flags: <defaults>
</compile_context>

<pallas_src>
import jax
import jax.numpy as jnp
from jax.experimental import pallas as pl
from jax.experimental.pallas import tpu as pltpu


def _round_up(x: int, m: int) -> int:
    return ((x + m - 1) // m) * m


def _fused_heads_kernel(state_ref, w_ref, b_ref, out_ref):
    # One fused matmul for both heads: (tile_b, H) @ (H, N_pad) on the MXU
    # with f32 accumulation; bias added in the f32 epilogue; lane-dense store.
    acc = jnp.dot(state_ref[...], w_ref[...], preferred_element_type=jnp.float32)
    out_ref[...] = (acc + b_ref[...]).astype(out_ref.dtype)


def prediction_network_forward(state, w_policy, b_policy, w_value, b_value,
                               *, tile_b=256, compute_dtype=None):
    """PredictionNetwork.forward as a single fused Pallas kernel.

    state:    (B, H)
    w_policy: (H, A)   b_policy: (A,)
    w_value:  (H, 1)   b_value:  (1,)
    Returns (policy_logits (B, A), value (B, 1)) in the original state dtype.

    compute_dtype: optionally cast state/weights (e.g. jnp.bfloat16 on
    v6e/v7x) while keeping f32 MXU accumulation.
    """
    B, H = state.shape
    A = w_policy.shape[1]
    orig_dtype = state.dtype

    # ---- Fuse the two heads (wrapper-side) and pad to a lane-dense width. ----
    N = A + 1                          # policy columns + value column
    N_pad = _round_up(N, 128)          # output last dim multiple of 128
    w = jnp.concatenate([w_policy, w_value], axis=1)            # (H, N)
    b = jnp.concatenate([b_policy, b_value], axis=0)[None, :]   # (1, N)
    w = jnp.pad(w, ((0, 0), (0, N_pad - N)))
    b = jnp.pad(b, ((0, 0), (0, N_pad - N))).astype(jnp.float32)

    if compute_dtype is not None:
        state = state.astype(compute_dtype)
        w = w.astype(compute_dtype)

    # ---- Batch tiling: pad B to a multiple of the (>=8) batch tile. ----
    tb = max(8, min(_round_up(tile_b, 8), _round_up(B, 8)))
    B_pad = _round_up(B, tb)
    if B_pad != B:
        state = jnp.pad(state, ((0, B_pad - B), (0, 0)))
    grid = (B_pad // tb,)

    # ---- Explicit VMEM budget (double-buffered state tile + resident W/b +
    #      output slab), so tiles re-derive cleanly on v7x's smaller VMEM. ----
    in_item = jnp.dtype(state.dtype).itemsize
    out_item = jnp.dtype(orig_dtype).itemsize
    vmem_est = (2 * tb * H * in_item          # state tile, double-buffered
                + 2 * H * N_pad * in_item     # resident fused weights
                + 2 * 8 * N_pad * 4           # bias row (padded to 8 sublanes)
                + 2 * tb * N_pad * out_item)  # lane-dense output slab
    vmem_limit = int(min(max(2 * vmem_est, 16 * 1024 * 1024), 32 * 1024 * 1024))

    out = pl.pallas_call(
        _fused_heads_kernel,
        grid=grid,
        in_specs=[
            pl.BlockSpec((tb, H), lambda i: (i, 0)),      # batch-tiled state
            pl.BlockSpec((H, N_pad), lambda i: (0, 0)),   # VMEM-resident fused W
            pl.BlockSpec((1, N_pad), lambda i: (0, 0)),   # VMEM-resident fused bias
        ],
        out_specs=pl.BlockSpec((tb, N_pad), lambda i: (i, 0)),
        out_shape=jax.ShapeDtypeStruct((B_pad, N_pad), orig_dtype),
        compiler_params=pltpu.CompilerParams(
            dimension_semantics=("parallel",),
            vmem_limit_bytes=vmem_limit,
        ),
    )(state, w, b)

    # Wrapper-side split of the fused, padded output slab.
    policy_logits = out[:B, :A]
    value = out[:B, A:A + 1]
    return policy_logits, value


if __name__ == "__main__":
    batch, hidden_dim, action_space_size = 2, 32, 8

    key = jax.random.PRNGKey(0)
    k_state, k_wp, k_bp, k_wv, k_bv = jax.random.split(key, 5)

    # Deterministic parameter init (PyTorch Linear-style uniform bound 1/sqrt(H)).
    bound = 1.0 / (hidden_dim ** 0.5)
    state = jax.random.normal(k_state, (batch, hidden_dim), dtype=jnp.float32)
    w_policy = jax.random.uniform(k_wp, (hidden_dim, action_space_size),
                                  minval=-bound, maxval=bound, dtype=jnp.float32)
    b_policy = jax.random.uniform(k_bp, (action_space_size,),
                                  minval=-bound, maxval=bound, dtype=jnp.float32)
    w_value = jax.random.uniform(k_wv, (hidden_dim, 1),
                                 minval=-bound, maxval=bound, dtype=jnp.float32)
    b_value = jax.random.uniform(k_bv, (1,),
                                 minval=-bound, maxval=bound, dtype=jnp.float32)

    policy_logits, value = prediction_network_forward(
        state, w_policy, b_policy, w_value, b_value)
    jax.block_until_ready((policy_logits, value))

    # Pure-JAX reference check (f32 path, matches PyTorch semantics).
    ref_policy = state @ w_policy + b_policy[None, :]
    ref_value = state @ w_value + b_value[None, :]
    assert policy_logits.shape == (batch, action_space_size)
    assert value.shape == (batch, 1)
    assert jnp.allclose(policy_logits, ref_policy, atol=1e-5)
    assert jnp.allclose(value, ref_value, atol=1e-5)

    print("KERNEL_OK")
</pallas_src>

<mosaic_0001>
module attributes {stable_mosaic.version = 11 : i64} {
  func.func @_fused_heads_kernel(%arg0: i32, %arg1: memref<8x32xf32, #tpu.memory_space<vmem>>, %arg2: memref<32x128xf32, #tpu.memory_space<vmem>>, %arg3: memref<1x128xf32, #tpu.memory_space<vmem>>, %arg4: memref<8x128xf32, #tpu.memory_space<vmem>>) attributes {dimension_semantics = [#tpu.dimension_semantics<parallel>], iteration_bounds = array<i64: 1>, scalar_prefetch = 0 : i64, scratch_operands = 0 : i64, tpu.core_type = #tpu.core_type<tc>, window_params = [{transform_indices = @transform_0, window_bounds = array<i64: 8, 32>}, {pipeline_mode = #tpu.pipeline_mode<synchronous>, transform_indices = @transform_1, window_bounds = array<i64: 32, 128>}, {pipeline_mode = #tpu.pipeline_mode<synchronous>, transform_indices = @transform_2, window_bounds = array<i64: 1, 128>}, {transform_indices = @transform_3, window_bounds = array<i64: 8, 128>}]} {
    %c0 = arith.constant 0 : index
    %c0_0 = arith.constant 0 : index
    %0 = vector.load %arg1[%c0, %c0_0] : memref<8x32xf32, #tpu.memory_space<vmem>>, vector<8x32xf32>
    %c0_1 = arith.constant 0 : index
    %c0_2 = arith.constant 0 : index
    %1 = vector.load %arg2[%c0_1, %c0_2] : memref<32x128xf32, #tpu.memory_space<vmem>>, vector<32x128xf32>
    %cst = arith.constant dense<0.000000e+00> : vector<8x128xf32>
    %2 = tpu.matmul %0, %1, %cst {dimension_numbers = #tpu.dot_dimension_numbers<[1], [0], [0], [1], [0, 0, 1, 1], [], []>} : vector<8x32xf32>, vector<32x128xf32>, vector<8x128xf32> -> vector<8x128xf32>
    %c0_3 = arith.constant 0 : index
    %c0_4 = arith.constant 0 : index
    %3 = vector.load %arg3[%c0_3, %c0_4] : memref<1x128xf32, #tpu.memory_space<vmem>>, vector<1x128xf32>
    %4 = vector.broadcast %3 : vector<1x128xf32> to vector<8x128xf32>
    %5 = arith.addf %2, %4 : vector<8x128xf32>
    %c0_5 = arith.constant 0 : index
    %c0_6 = arith.constant 0 : index
    %6 = vector.load %arg4[%c0_5, %c0_6] : memref<8x128xf32, #tpu.memory_space<vmem>>, vector<8x128xf32>
    tpu.vector_store %arg4[%c0_5, %c0_6], %5 {strides = array<i32>} : memref<8x128xf32, #tpu.memory_space<vmem>>, vector<8x128xf32>,
    return
  }
  func.func @transform_0(%arg0: i32) -> (i32, i32) {
    %c0_i32 = arith.constant 0 : i32
    %c0_i32_0 = arith.constant 0 : i32
    return %arg0, %c0_i32 : i32, i32
  }
  func.func @transform_1(%arg0: i32) -> (i32, i32) {
    %c0_i32 = arith.constant 0 : i32
    %c0_i32_0 = arith.constant 0 : i32
    %c0_i32_1 = arith.constant 0 : i32
    return %c0_i32, %c0_i32_0 : i32, i32
  }
  func.func @transform_2(%arg0: i32) -> (i32, i32) {
    %c0_i32 = arith.constant 0 : i32
    %c0_i32_0 = arith.constant 0 : i32
    %c0_i32_1 = arith.constant 0 : i32
    return %c0_i32, %c0_i32_0 : i32, i32
  }
  func.func @transform_3(%arg0: i32) -> (i32, i32) {
    %c0_i32 = arith.constant 0 : i32
    %c0_i32_0 = arith.constant 0 : i32
    return %arg0, %c0_i32 : i32, i32
  }
}

</mosaic_0001>

<bundles_post_ra>
// kernel: tpu_custom_call.1
= control target key start
LH: loop header
LB: loop body
LE: loop exit
PB: predicated region body
PF: predicated region fallthrough
CT: control target
= control target key end

     0   :  { %8 = vsyncpa [#allocation3], 0  ;;  %s322_s0 = inlined_call_operand.hbm [shape: f32[8,32], index: 0, kind: input, shape index: {}]   ;;  %s323_s1 = inlined_call_operand.hbm [shape: f32[32,128], index: 1, kind: input, shape index: {}]   ;;  %s324_s2 = inlined_call_operand.vmem [shape: f32[1,128], index: 2, kind: input, shape index: {}]   ;;  %s325_s3 = inlined_call_operand.hbm [shape: f32[8,128], index: 3, kind: output, shape index: {}]  }
   0x1   :  { %9 = vsyncpa [#allocation6], 0 }
   0x2   :  { %10 = vsyncpa [#allocation4], 0  ;;  %s248_s12 = smov [#allocation2]   ;;  %s249_s14 = smov [#allocation5]  }
   0x3   :  { %s17_s13 = sshll.u32 %s248_s12, 4  ;;  %s26_s15 = sshll.u32 %s249_s14, 4  ;;  %s18_s13 = int_to_ptr.vmem [resolvable:$true] %s17_s13  ;;  %s276_s15 = int_to_ptr.vmem [resolvable:$true] %s26_s15 }
   0x4   :  { %s176_s18 = scalar_lea.hbm %s322_s0, 128 }
   0x5   :  { %p177_p0 = scmp.ne.s32.totalorder %s322_s0, %s176_s18  ;;  %p180_p1 = scmp.lt.u32.totalorder %s176_s18, %s322_s0 }
   0x7   :  { %p182_p2 = pnand %p180_p1, %p177_p0 }
   0x9   :  { %185 = shalt.err (!%p182_p2)
}
   0xa   :  { %s186_s23 = scalar_lea.vmem %s18_s13, 128  ;;  %p191_p4 = scmp.lt.s32.totalorder %s18_s13, %s18_s13 }
   0xb   :  { %p187_p3 = scmp.ne.s32.totalorder %s18_s13, %s186_s23  ;;  %p192_p5 = scmp.lt.s32.totalorder %s186_s23, %s186_s23 }
   0xd   :  { %p193_p6 = por %p192_p5, %p191_p4 }
   0xf   :  { %p194_p7 = pnand %p193_p6, %p187_p3 }
  0x11   :  { %197 = shalt.err (!%p194_p7)
}
  0x12   :  { %20 = dma.hbm_to_vmem [thread:$0]  %s322_s0, 128, %s18_s13, [#allocation3]  }
  0x13   :  { %s198_s28 = scalar_lea.hbm %s323_s1, 512 }
  0x14   :  { %p199_p8 = scmp.ne.s32.totalorder %s323_s1, %s198_s28  ;;  %p202_p9 = scmp.lt.u32.totalorder %s198_s28, %s323_s1 }
  0x16   :  { %p204_p10 = pnand %p202_p9, %p199_p8 }
  0x18   :  { %207 = shalt.err (!%p204_p10)
}
  0x19   :  { %s208_s6 = scalar_lea.vmem %s276_s15, 512  ;;  %p213_p12 = scmp.lt.s32.totalorder %s276_s15, %s276_s15 }
  0x1a   :  { %p209_p11 = scmp.ne.s32.totalorder %s276_s15, %s208_s6  ;;  %p214_p13 = scmp.lt.s32.totalorder %s208_s6, %s208_s6 }
  0x1c   :  { %p215_p0 = por %p214_p13, %p213_p12 }
  0x1e   :  { %p216_p1 = pnand %p215_p0, %p209_p11 }
  0x20   :  { %219 = shalt.err (!%p216_p1)
}
  0x21   :  { %s250_s0 = smov 128   ;;  %s251_s7 = smov 8  }
  0x22   :  { %32 = dma.hbm_to_vmem [thread:$0]  %s323_s1, 512, %s276_s15, [#allocation6], %s250_s0, %s250_s0, %s251_s7  }
  0x23   :  { %242 = dma.done.wait [#allocation3], 128  }
  0x24   :  { %243 = vsyncadd [#allocation3], 4294967168 }
  0x25   :  { %244 = dma.done.wait [#allocation6], 512  }
  0x26   :  { %245 = vsyncadd [#allocation6], 4294966784  ;;  %v252_v0 = vmov 0.0|0.0   ;;  %vm253_vm0 = vmmov 0   ;;  %v254_v1 = vmov 0.0   ;;  %v42_v2 = vld [vmem:[#allocation5] sm:$0xff] }
  0x27   :  { %162 = vmatprep.subr.bf16.mxu0 %v252_v0  ;;  %159 = vmatprep.mubr.msk.f32.mxu0 %vm253_vm0, %v254_v1  ;;  %v43_v3 = vld [vmem:[#allocation5 + $0x8] sm:$0xff]  ;;  %v44_v4 = vld [vmem:[#allocation5 + $0x10] sm:$0xff]  ;;  %v45_v6 = vld [vmem:[#allocation5 + $0x18] sm:$0xff]  ;;  %vm53_vm1 = vcmask 261120   ;;  %s255_s11 = smov [#allocation7]  }
  0x28   :  { %v163_v5 = vpack.c.bf16 %v43_v3, %v42_v2  ;;  %v166_v7 = vpack.c.bf16 %v45_v6, %v44_v4  ;;  %v41_v8 = vld [vmem:[#allocation2] sm:$0xff]  ;;  %s134_s12 = sshll.u32 %s255_s11, 4  ;;  %s135_s12 = int_to_ptr.vmem [resolvable:$true] %s134_s12 }
  0x29   :  { %v144_v9 = vld [vmem:[%s324_s2] ss:$0 sm:$0xff]  ;;  %s220_s13 = scalar_lea.vmem %s135_s12, 128  ;;  %p225_p3 = scmp.lt.s32.totalorder %s135_s12, %s135_s12 }
  0x2a   :  { %164 = vmatpush3.bf16.msra.mxu0 %v163_v5  ;;  %p221_p2 = scmp.ne.s32.totalorder %s135_s12, %s220_s13  ;;  %p226_p4 = scmp.lt.s32.totalorder %s220_s13, %s220_s13 }
  0x2b   :  { %165 = vmatprep.subr.bf16.mxu0 %v252_v0 }
  0x2c   :  { %p227_p5 = por %p226_p4, %p225_p3 }
  0x2e   :  { %167 = vmatpush3.bf16.msra.mxu0 %v166_v7  ;;  %p228_p6 = pnand %p227_p5, %p221_p2 }
  0x31   :  { %160 = vmatmul.mubr.msk.f32.vlgmr.msra.gmra.mrb[0].mxu0 %vm53_vm1, %v41_v8 }
 0x104   :  { %v123_v10 = vpop.f32.mrb[0].mxu0 }
 0x105   :  { %v124_v11 = vadd.f32 %v144_v9, %v123_v10  ;;  %v161_v12 = vpop.f32.mrb[1].mxu0 }
 0x107   :  { %127 = vst [vmem:[#allocation7] sm:$0xff] %v124_v11 }
 0x108   :  { %231 = shalt.err (!%p228_p6)
}
 0x109   :  { %s232_s16 = scalar_lea.hbm %s325_s3, 128 }
 0x10a   :  { %p233_p7 = scmp.ne.s32.totalorder %s325_s3, %s232_s16  ;;  %p236_p8 = scmp.lt.u32.totalorder %s232_s16, %s325_s3 }
 0x10c   :  { %p238_p9 = pnand %p236_p8, %p233_p7 }
 0x10e   :  { %241 = shalt.err (!%p238_p9)
}
 0x10f   :  { %137 = dma.vmem_to_hbm [thread:$0]  %s135_s12, 128, %s325_s3, [#allocation4]  }
 0x110   :  { %246 = dma.done.wait [#allocation4], 128  }
 0x111   :  { %247 = vsyncadd [#allocation4], 4294967168 }
 0x112   :  { %141 = vsyncpa [#allocation3], 1 }
 0x113   :  { %142 = vsyncpa [#allocation6], 1 }
 0x114   :  { %143 = vsyncpa [#allocation4], 1 }

</bundles_post_ra>
